<compile_context>
chip_gen: v7x
topology: tpu7x:2x2x1
jax: 0.10.0
libtpu: 0.0.40
codegen_flags: <defaults>
</compile_context>

<pallas_src>
import jax
import jax.numpy as jnp
from jax.experimental import pallas as pl
from jax.experimental.pallas import tpu as pltpu


def _pv_kernel_single(x_ref, at_ref, o_ref):
    # x_ref : (TB, K)   flattened X tile, lane-dense (K = N*N)
    # at_ref: (K, M)    folded weight A^T = (W (x) s)^T, resident in VMEM
    # o_ref : (TB, M)
    o_ref[...] = jnp.dot(
        x_ref[...], at_ref[...], preferred_element_type=jnp.float32
    ).astype(o_ref.dtype)


def _pv_kernel_ktiled(x_ref, at_ref, o_ref, acc_ref):
    # Same math, contraction axis K tiled over grid axis 1 with an f32 accumulator.
    k = pl.program_id(1)

    @pl.when(k == 0)
    def _():
        acc_ref[...] = jnp.zeros_like(acc_ref)

    acc_ref[...] += jnp.dot(
        x_ref[...], at_ref[...], preferred_element_type=jnp.float32
    )

    @pl.when(k == pl.num_programs(1) - 1)
    def _():
        o_ref[...] = acc_ref[...].astype(o_ref.dtype)


def _chip_defaults():
    """(target X-block bytes, vmem_limit_bytes) tuned per TPU generation."""
    try:
        kind = jax.devices()[0].device_kind.lower()
    except Exception:
        kind = ""
    if "v7" in kind:
        return 12 << 20, 48 << 20   # 64 MiB physical VMEM / TC, 3.2 TB/s HBM
    if "v6" in kind:
        return 16 << 20, 96 << 20   # 128 MiB physical VMEM
    return 8 << 20, 64 << 20        # v5e / unknown: 0.82 TB/s, modest blocks suffice


def parametric_vectorize(x: jax.Array, weight: jax.Array,
                         *, target_block_bytes: int | None = None,
                         vmem_limit_bytes: int | None = None) -> jax.Array:
    """x: (B, N, N) float32, weight: (M, N) float32 -> (B, M) float32."""
    B, N, N2 = x.shape
    assert N == N2, "input must be (batch, input_size, input_size)"
    M, Nw = weight.shape
    assert Nw == N
    K = N * N

    # ---- fold mean + both W matmuls into one (K, M) matrix (exact rewrite) ----
    w32 = weight.astype(jnp.float32)
    s = jnp.sum(w32, axis=0) * (1.0 / M)                           # (N,)
    a_t = (w32[:, :, None] * s[None, None, :]).reshape(M, K).T     # (K, M)
    a_t = a_t.astype(jnp.float32)

    x_flat = x.reshape(B, K)   # row-major collapse: no data movement

    # ---- block sizing -------------------------------------------------------
    default_tbb, default_vmem = _chip_defaults()
    if target_block_bytes is None:
        target_block_bytes = default_tbb
    if vmem_limit_bytes is None:
        vmem_limit_bytes = default_vmem

    itemsize = x.dtype.itemsize
    bytes_per_row = K * itemsize
    tb = int(min(B, max(1, target_block_bytes // bytes_per_row)))
    if tb < B:
        # Multiple of 8 so the (tb, K)/(tb, M) blocks are sublane-aligned.
        tb = max(8, (tb // 8) * 8)
        tb = min(tb, B)
    elif B >= 16:
        # Keep at least 2 batch blocks so the "parallel" grid axis can shard
        # across both v7x TensorCores (costs one ~0.35 us step elsewhere).
        tb = max(8, (((B + 1) // 2) // 8) * 8)
    num_b = pl.cdiv(B, tb)   # ragged tail handled by Pallas block clamping

    # ---- contraction tiling (only if A^T is large) --------------------------
    at_budget = 8 << 20
    tk = K
    if K * M * 4 > at_budget:
        cand = max(128, ((at_budget // (M * 4)) // 128) * 128)
        while cand >= 128 and K % cand != 0:
            cand -= 128
        if cand >= 128:
            tk = cand
        # else: keep tk = K (correct, just holds all of A^T in VMEM).
        # TODO(synk): pad A^T with zero rows to enable ragged-K tiling safely.
    num_k = K // tk if K % tk == 0 else 1
    if num_k == 1:
        tk = K

    cost = pl.CostEstimate(
        flops=2 * B * K * M,
        transcendentals=0,
        bytes_accessed=B * K * itemsize + K * M * 4 + B * M * itemsize,
    )

    if num_k == 1:
        out = pl.pallas_call(
            _pv_kernel_single,
            out_shape=jax.ShapeDtypeStruct((B, M), x.dtype),
            grid_spec=pltpu.PrefetchScalarGridSpec(
                num_scalar_prefetch=0,
                grid=(num_b,),
                in_specs=[
                    pl.BlockSpec((tb, K), lambda b: (b, 0)),
                    pl.BlockSpec((K, M), lambda b: (0, 0)),
                ],
                out_specs=pl.BlockSpec((tb, M), lambda b: (b, 0)),
            ),
            compiler_params=pltpu.CompilerParams(
                dimension_semantics=("parallel",),
                vmem_limit_bytes=vmem_limit_bytes,
            ),
            cost_estimate=cost,
        )(x_flat, a_t)
    else:
        out = pl.pallas_call(
            _pv_kernel_ktiled,
            out_shape=jax.ShapeDtypeStruct((B, M), x.dtype),
            grid_spec=pltpu.PrefetchScalarGridSpec(
                num_scalar_prefetch=0,
                grid=(num_b, num_k),
                in_specs=[
                    pl.BlockSpec((tb, tk), lambda b, k: (b, k)),
                    pl.BlockSpec((tk, M), lambda b, k: (k, 0)),
                ],
                out_specs=pl.BlockSpec((tb, M), lambda b, k: (b, 0)),
                scratch_shapes=[pltpu.VMEM((tb, M), jnp.float32)],
            ),
            compiler_params=pltpu.CompilerParams(
                dimension_semantics=("parallel", "arbitrary"),
                vmem_limit_bytes=vmem_limit_bytes,
            ),
            cost_estimate=cost,
        )(x_flat, a_t)

    return out


if __name__ == "__main__":
    key = jax.random.PRNGKey(0)

    def ref_fn(x, w):
        # Plain-JAX reference: same math as the torch module.
        return jnp.mean(jnp.einsum("mn,bnk,lk->bml", w, x, w), axis=2)

    # Test 1: module-sized shapes, weight = ones like nn.Parameter init.
    batch, input_size, output_size = 2, 16, 8
    weight = jnp.ones((output_size, input_size), dtype=jnp.float32)
    x = jax.random.normal(key, (batch, input_size, input_size), dtype=jnp.float32)
    out = jax.block_until_ready(parametric_vectorize(x, weight))
    assert out.shape == (batch, output_size)
    assert jnp.allclose(out, ref_fn(x, weight), atol=1e-3, rtol=1e-4), "mismatch (test 1)"

    # Test 2: random weight + ragged batch exercising multi-block tiling
    # (no padding copy: Pallas clamps the partial last block).
    k1, k2 = jax.random.split(key)
    batch2 = 20
    w2 = jax.random.normal(k1, (output_size, input_size), dtype=jnp.float32)
    x2 = jax.random.normal(k2, (batch2, input_size, input_size), dtype=jnp.float32)
    out2 = jax.block_until_ready(
        parametric_vectorize(x2, w2, target_block_bytes=2048))
    assert out2.shape == (batch2, output_size)
    assert jnp.allclose(out2, ref_fn(x2, w2), atol=1e-3, rtol=1e-4), "mismatch (test 2)"

    print("KERNEL_OK")
</pallas_src>

<mosaic_0001>
module attributes {stable_mosaic.version = 11 : i64} {
  func.func @_pv_kernel_single(%arg0: i32, %arg1: memref<2x256xf32, #tpu.memory_space<vmem>>, %arg2: memref<256x8xf32, #tpu.memory_space<vmem>>, %arg3: memref<2x8xf32, #tpu.memory_space<vmem>>) attributes {dimension_semantics = [#tpu.dimension_semantics<parallel>], iteration_bounds = array<i64: 1>, scalar_prefetch = 0 : i64, scratch_operands = 0 : i64, tpu.core_type = #tpu.core_type<tc>, window_params = [{transform_indices = @transform_0, window_bounds = array<i64: 2, 256>}, {pipeline_mode = #tpu.pipeline_mode<synchronous>, transform_indices = @transform_1, window_bounds = array<i64: 256, 8>}, {transform_indices = @transform_2, window_bounds = array<i64: 2, 8>}]} {
    %c0 = arith.constant 0 : index
    %c0_0 = arith.constant 0 : index
    %0 = vector.load %arg1[%c0, %c0_0] : memref<2x256xf32, #tpu.memory_space<vmem>>, vector<2x256xf32>
    %c0_1 = arith.constant 0 : index
    %c0_2 = arith.constant 0 : index
    %1 = vector.load %arg2[%c0_1, %c0_2] : memref<256x8xf32, #tpu.memory_space<vmem>>, vector<256x8xf32>
    %cst = arith.constant dense<0.000000e+00> : vector<2x8xf32>
    %2 = tpu.matmul %0, %1, %cst {dimension_numbers = #tpu.dot_dimension_numbers<[1], [0], [0], [1], [0, 0, 1, 1], [], []>} : vector<2x256xf32>, vector<256x8xf32>, vector<2x8xf32> -> vector<2x8xf32>
    %c0_3 = arith.constant 0 : index
    %c0_4 = arith.constant 0 : index
    %3 = vector.load %arg3[%c0_3, %c0_4] : memref<2x8xf32, #tpu.memory_space<vmem>>, vector<2x8xf32>
    tpu.vector_store %arg3[%c0_3, %c0_4], %2 {strides = array<i32>} : memref<2x8xf32, #tpu.memory_space<vmem>>, vector<2x8xf32>,
    return
  }
  func.func @transform_0(%arg0: i32) -> (i32, i32) {
    %c0_i32 = arith.constant 0 : i32
    %c0_i32_0 = arith.constant 0 : i32
    return %arg0, %c0_i32 : i32, i32
  }
  func.func @transform_1(%arg0: i32) -> (i32, i32) {
    %c0_i32 = arith.constant 0 : i32
    %c0_i32_0 = arith.constant 0 : i32
    %c0_i32_1 = arith.constant 0 : i32
    return %c0_i32, %c0_i32_0 : i32, i32
  }
  func.func @transform_2(%arg0: i32) -> (i32, i32) {
    %c0_i32 = arith.constant 0 : i32
    %c0_i32_0 = arith.constant 0 : i32
    return %arg0, %c0_i32 : i32, i32
  }
}

</mosaic_0001>

<bundles_post_ra>
// kernel: tpu_custom_call.1
= control target key start
LH: loop header
LB: loop body
LE: loop exit
PB: predicated region body
PF: predicated region fallthrough
CT: control target
= control target key end

     0   :  { %7 = vsyncpa [#allocation3], 0  ;;  %s378_s0 = inlined_call_operand.hbm [shape: f32[2,256], index: 0, kind: input, shape index: {}]   ;;  %s379_s1 = inlined_call_operand.hbm [shape: f32[256,8], index: 1, kind: input, shape index: {}]   ;;  %s380_s2 = inlined_call_operand.hbm [shape: f32[2,8], index: 2, kind: output, shape index: {}]  }
   0x1   :  { %8 = vsyncpa [#allocation6], 0 }
   0x2   :  { %9 = vsyncpa [#allocation4], 0  ;;  %s315_s9 = smov [#allocation2]   ;;  %s316_s11 = smov [#allocation5]  }
   0x3   :  { %s16_s10 = sshll.u32 %s315_s9, 4  ;;  %s25_s12 = sshll.u32 %s316_s11, 4  ;;  %s17_s10 = int_to_ptr.vmem [resolvable:$true] %s16_s10  ;;  %s335_s12 = int_to_ptr.vmem [resolvable:$true] %s25_s12 }
   0x4   :  { %s243_s15 = scalar_lea.hbm %s378_s0, 64 }
   0x5   :  { %p244_p0 = scmp.ne.s32.totalorder %s378_s0, %s243_s15  ;;  %p247_p1 = scmp.lt.u32.totalorder %s243_s15, %s378_s0 }
   0x7   :  { %p249_p2 = pnand %p247_p1, %p244_p0 }
   0x9   :  { %252 = shalt.err (!%p249_p2)
}
   0xa   :  { %s253_s20 = scalar_lea.vmem %s17_s10, 64  ;;  %p258_p4 = scmp.lt.s32.totalorder %s17_s10, %s17_s10 }
   0xb   :  { %p254_p3 = scmp.ne.s32.totalorder %s17_s10, %s253_s20  ;;  %p259_p5 = scmp.lt.s32.totalorder %s253_s20, %s253_s20 }
   0xd   :  { %p260_p6 = por %p259_p5, %p258_p4 }
   0xf   :  { %p261_p7 = pnand %p260_p6, %p254_p3 }
  0x11   :  { %264 = shalt.err (!%p261_p7)
}
  0x12   :  { %19 = dma.hbm_to_vmem [thread:$0]  %s378_s0, 64, %s17_s10, [#allocation3]  }
  0x13   :  { %s265_s25 = scalar_lea.hbm %s379_s1, 4096 }
  0x14   :  { %p266_p8 = scmp.ne.s32.totalorder %s379_s1, %s265_s25  ;;  %p269_p9 = scmp.lt.u32.totalorder %s265_s25, %s379_s1 }
  0x16   :  { %p271_p10 = pnand %p269_p9, %p266_p8 }
  0x18   :  { %274 = shalt.err (!%p271_p10)
}
  0x19   :  { %s275_s30 = scalar_lea.vmem %s335_s12, 4096  ;;  %p280_p12 = scmp.lt.s32.totalorder %s335_s12, %s335_s12 }
  0x1a   :  { %p276_p11 = scmp.ne.s32.totalorder %s335_s12, %s275_s30  ;;  %p281_p13 = scmp.lt.s32.totalorder %s275_s30, %s275_s30 }
  0x1c   :  { %p282_p0 = por %p281_p13, %p280_p12 }
  0x1e   :  { %p283_p1 = pnand %p282_p0, %p276_p11 }
  0x20   :  { %286 = shalt.err (!%p283_p1)
}
  0x21   :  { %s317_s0 = smov 128   ;;  %s318_s3 = smov 8  }
  0x22   :  { %31 = dma.hbm_to_vmem [thread:$0]  %s379_s1, 4096, %s335_s12, [#allocation6], %s317_s0, %s317_s0, %s318_s3  }
  0x23   :  { %309 = dma.done.wait [#allocation3], 64  }
  0x24   :  { %310 = vsyncadd [#allocation3], 4294967232 }
  0x25   :  { %311 = dma.done.wait [#allocation6], 4096  }
  0x26   :  { %312 = vsyncadd [#allocation6], 4294963200  ;;  %v55_v0 = vld [vmem:[#allocation5 + $0x80] sm:$0xff]  ;;  %v56_v1 = vld [vmem:[#allocation5 + $0x88] sm:$0xff]  ;;  %s319_s1 = smov [#allocation7]   ;;  %vm152_vm0 = vcmask 58368  }
  0x27   :  { %v39_v2 = vld [vmem:[#allocation5] sm:$0xff]  ;;  %v206_v3 = vpack.c.bf16 %v56_v1, %v55_v0  ;;  %v40_v4 = vld [vmem:[#allocation5 + $0x8] sm:$0xff]  ;;  %v57_v5 = vld [vmem:[#allocation5 + $0x90] sm:$0xff]  ;;  %s160_s6 = sshll.u32 %s319_s1, 4  ;;  %s161_s6 = int_to_ptr.vmem [resolvable:$true] %s160_s6 }
  0x28   :  { %v58_v6 = vld [vmem:[#allocation5 + $0x98] sm:$0xff]  ;;  %v208_v7 = vpack.c.bf16 %v40_v4, %v39_v2  ;;  %v41_v9 = vld [vmem:[#allocation5 + $0x10] sm:$0xff]  ;;  %v59_v11 = vld [vmem:[#allocation5 + $0xa0] sm:$0xff]  ;;  %s287_s7 = scalar_lea.vmem %s161_s6, 32  ;;  %p292_p3 = scmp.lt.s32.totalorder %s161_s6, %s161_s6 }
  0x29   :  { %v210_v8 = vpack.c.bf16 %v58_v6, %v57_v5  ;;  %v42_v10 = vld [vmem:[#allocation5 + $0x18] sm:$0xff]  ;;  %207 = vmatprep.subr.bf16.mxu0 %v206_v3  ;;  %v60_v12 = vld [vmem:[#allocation5 + $0xa8] sm:$0xff]  ;;  %v43_v15 = vld [vmem:[#allocation5 + $0x20] sm:$0xff]  ;;  %p288_p2 = scmp.ne.s32.totalorder %s161_s6, %s287_s7  ;;  %p293_p4 = scmp.lt.s32.totalorder %s287_s7, %s287_s7 }
  0x2a   :  { %209 = vmatpush3.bf16.msra.mxu0 %v208_v7  ;;  %v212_v13 = vpack.c.bf16 %v42_v10, %v41_v9  ;;  %v214_v14 = vpack.c.bf16 %v60_v12, %v59_v11  ;;  %v44_v16 = vld [vmem:[#allocation5 + $0x28] sm:$0xff]  ;;  %v61_v17 = vld [vmem:[#allocation5 + $0xb0] sm:$0xff]  ;;  %v62_v18 = vld [vmem:[#allocation5 + $0xb8] sm:$0xff] }
  0x2b   :  { %211 = vmatprep.subr.bf16.mxu0 %v210_v8  ;;  %v216_v19 = vpack.c.bf16 %v44_v16, %v43_v15  ;;  %v218_v20 = vpack.c.bf16 %v62_v18, %v61_v17  ;;  %v45_v21 = vld [vmem:[#allocation5 + $0x30] sm:$0xff]  ;;  %v46_v22 = vld [vmem:[#allocation5 + $0x38] sm:$0xff]  ;;  %v63_v23 = vld [vmem:[#allocation5 + $0xc0] sm:$0xff]  ;;  %p294_p5 = por %p293_p4, %p292_p3 }
  0x2c   :  { %v64_v24 = vld [vmem:[#allocation5 + $0xc8] sm:$0xff]  ;;  %v170_v25 = vld.sshfl [vmem:[#allocation2] sm:$0x33 pattern:$0x76325410]  ;;  %v220_v27 = vpack.c.bf16 %v46_v22, %v45_v21  ;;  %v47_v29 = vld [vmem:[#allocation5 + $0x40] sm:$0xff] }
  0x2d   :  { %v79_v26 = vcombine.high %v170_v25, %v170_v25  ;;  %v222_v28 = vpack.c.bf16 %v64_v24, %v63_v23  ;;  %v48_v30 = vld [vmem:[#allocation5 + $0x48] sm:$0xff]  ;;  %v65_v31 = vld [vmem:[#allocation5 + $0xd0] sm:$0xff]  ;;  %v66_v32 = vld [vmem:[#allocation5 + $0xd8] sm:$0xff]  ;;  %p295_p6 = pnand %p294_p5, %p288_p2 }
  0x2e   :  { %213 = vmatpush3.bf16.msra.mxu0 %v212_v13  ;;  %v224_v33 = vpack.c.bf16 %v48_v30, %v47_v29  ;;  %v226_v34 = vpack.c.bf16 %v66_v32, %v65_v31  ;;  %v49_v35 = vld [vmem:[#allocation5 + $0x50] sm:$0xff]  ;;  %v50_v36 = vld [vmem:[#allocation5 + $0x58] sm:$0xff]  ;;  %v67_v37 = vld [vmem:[#allocation5 + $0xe0] sm:$0xff] }
  0x2f   :  { %215 = vmatprep.subr.bf16.mxu0 %v214_v14  ;;  %146 = vmatprep.mubr.f32.mxu0 %v79_v26  ;;  %v68_v38 = vld [vmem:[#allocation5 + $0xe8] sm:$0xff]  ;;  %v228_v39 = vpack.c.bf16 %v50_v36, %v49_v35  ;;  %v51_v41 = vld [vmem:[#allocation5 + $0x60] sm:$0xff]  ;;  %v69_v43 = vld [vmem:[#allocation5 + $0xf0] sm:$0xff] }
  0x30   :  { %v230_v40 = vpack.c.bf16 %v68_v38, %v67_v37  ;;  %v52_v42 = vld [vmem:[#allocation5 + $0x68] sm:$0xff]  ;;  %v70_v44 = vld [vmem:[#allocation5 + $0xf8] sm:$0xff]  ;;  %v53_v47 = vld [vmem:[#allocation5 + $0x70] sm:$0xff] }
  0x31   :  { %v232_v45 = vpack.c.bf16 %v52_v42, %v51_v41  ;;  %v234_v46 = vpack.c.bf16 %v70_v44, %v69_v43  ;;  %v54_v48 = vld [vmem:[#allocation5 + $0x78] sm:$0xff] }
  0x32   :  { %217 = vmatpush3.bf16.msra.mxu0 %v216_v19  ;;  %v236_v49 = vpack.c.bf16 %v54_v48, %v53_v47 }
  0x33   :  { %219 = vmatprep.subr.bf16.mxu0 %v218_v20 }
  0x36   :  { %221 = vmatpush3.bf16.msra.mxu0 %v220_v27 }
  0x37   :  { %223 = vmatprep.subr.bf16.mxu0 %v222_v28 }
  0x3a   :  { %225 = vmatpush3.bf16.msra.mxu0 %v224_v33 }
  0x3b   :  { %227 = vmatprep.subr.bf16.mxu0 %v226_v34 }
  0x3e   :  { %229 = vmatpush3.bf16.msra.mxu0 %v228_v39 }
  0x3f   :  { %231 = vmatprep.subr.bf16.mxu0 %v230_v40 }
  0x42   :  { %233 = vmatpush3.bf16.msra.mxu0 %v232_v45 }
  0x43   :  { %235 = vmatprep.subr.bf16.mxu0 %v234_v46 }
  0x46   :  { %237 = vmatpush3.bf16.msra.mxu0 %v236_v49 }
  0x49   :  { %147 = vmatmul.mubr.f32.vlgmr.msra.gmra.mrb[0].mxu0 %v170_v25 }
 0x11c   :  { %v203_v50 = vpop.f32.mrb[0].mxu0 }
 0x11d   :  { %v204_v51 = vpop.f32.mrb[1].mxu0 }
 0x11e   :  { %v205_v52 = vadd.f32 %v204_v51, %v203_v50 }
 0x120   :  { %153 = vst.msk [vmem:[#allocation7] sm:$0x3] %vm152_vm0, %v205_v52 }
 0x121   :  { %298 = shalt.err (!%p295_p6)
}
 0x122   :  { %s299_s10 = scalar_lea.hbm %s380_s2, 32 }
 0x123   :  { %p300_p7 = scmp.ne.s32.totalorder %s380_s2, %s299_s10  ;;  %p303_p8 = scmp.lt.u32.totalorder %s299_s10, %s380_s2 }
 0x125   :  { %p305_p9 = pnand %p303_p8, %p300_p7 }
 0x127   :  { %308 = shalt.err (!%p305_p9)
}
 0x128   :  { %163 = dma.vmem_to_hbm [thread:$0]  %s161_s6, 32, %s380_s2, [#allocation4]  }
 0x129   :  { %313 = dma.done.wait [#allocation4], 32  }
 0x12a   :  { %314 = vsyncadd [#allocation4], 4294967264 }
 0x12b   :  { %167 = vsyncpa [#allocation3], 1 }
 0x12c   :  { %168 = vsyncpa [#allocation6], 1 }
 0x12d   :  { %169 = vsyncpa [#allocation4], 1 }

</bundles_post_ra>
